<compile_context>
chip_gen: v7x
topology: tpu7x:2x2x1
jax: 0.10.0
libtpu: 0.0.40
codegen_flags: <defaults>
</compile_context>

<pallas_src>
import functools
import math

import jax
import jax.numpy as jnp
from jax.experimental import pallas as pl
from jax.experimental.pallas import tpu as pltpu

_TWO_PI = 2.0 * math.pi


def _round_up(n, m):
    return ((n + m - 1) // m) * m


def _tpu_vmem_capacity_bytes():
    try:
        info = pltpu.get_tpu_info()
        cap = getattr(info, "vmem_capacity_bytes", None)
        if cap:
            return int(cap)
    except Exception:
        pass
    return 64 * 1024 * 1024     # conservative default (v7x-class)


# ---------------------------------------------------------------------------
# Kernel
# ---------------------------------------------------------------------------
def _pbld_kernel(*refs, use_relu, fuse_densenet, concat_store):
    """One (feature-group, batch-tile) step.

    refs = (x_rep, w1, b1, w2, b2, [x_pass], out)
      x_rep : (Bt, Fg*K) f32   x repeated K times per feature (group slab)
      w1    : (1,  Fg*K) f32   2*pi*weight_1 flattened
      b1    : (1,  Fg*K) f32
      w2    : (Fg*K, Fg*H)     block-diagonal per-group weight (f32 or bf16)
      b2    : (1,  Fg*H) f32
      x_pass: (Bt, F)    f32   only on the fused (single-group) densenet path
      out   : (Bt, Fg*H [+F])
    """
    if fuse_densenet:
        x_rep_ref, w1_ref, b1_ref, w2_ref, b2_ref, x_ref, o_ref = refs
    else:
        x_rep_ref, w1_ref, b1_ref, w2_ref, b2_ref, o_ref = refs

    # Phase + cos entirely on VPU/EUP (no MXU needed: W1 is per-feature scalar).
    phase = x_rep_ref[...] * w1_ref[...] + b1_ref[...]          # (Bt, Fg*K)
    t = jnp.cos(phase)
    w2 = w2_ref[...]                                            # (Fg*K, Fg*H)
    emb = jnp.dot(t.astype(w2.dtype), w2,
                  preferred_element_type=jnp.float32)           # MXU
    emb = emb + b2_ref[...]
    if use_relu:
        emb = jnp.maximum(emb, 0.0)
    emb = emb.astype(o_ref.dtype)

    if fuse_densenet:
        xv = x_ref[...].astype(o_ref.dtype)
        if concat_store:
            # Single full-width lane-dense store of the output block.
            o_ref[...] = jnp.concatenate([emb, xv], axis=-1)
        else:
            ew = emb.shape[-1]
            o_ref[:, :ew] = emb
            o_ref[:, ew:] = xv
    else:
        o_ref[...] = emb


# ---------------------------------------------------------------------------
# One-time parameter re-layout (hoist out of the per-call path!)
# ---------------------------------------------------------------------------
def _choose_group_size(F, K, H, w_itemsize, single_group_w2_bytes=4 << 20):
    # Small F: fuse all features into one block-diagonal group (typical tabular case).
    if (F * K) * (F * H) * w_itemsize <= single_group_w2_bytes:
        return F
    # Otherwise block features so Fg*K is near the MXU contraction sweet spot and
    # Fg*H is a multiple of 128 (keeps the per-group output stores lane-dense).
    fg = max(1, 512 // max(K, 1))
    lane_mult = 128 // math.gcd(H, 128)
    fg = _round_up(fg, lane_mult)
    return min(fg, F)


def prepare_pbld_params(weight_1, bias_1, weight_2, bias_2, *,
                        group_size=None, weights_dtype=jnp.float32):
    """Re-layout the PBLD parameters for the kernel.

    Call once and reuse (e.g. whenever the weights change), NOT per forward:
    rebuilding would re-materialize the block-diagonal W2 in HBM every call.
    """
    F, _one, K = weight_1.shape
    H = weight_2.shape[-1]
    w_itemsize = jnp.dtype(weights_dtype).itemsize

    if group_size is None:
        Fg = _choose_group_size(F, K, H, w_itemsize)
    else:
        Fg = max(1, min(int(group_size), F))
        if Fg < F:                                   # keep blocked out-stores lane-dense
            lane_mult = 128 // math.gcd(H, 128)
            Fg = min(_round_up(Fg, lane_mult), F)
    G = -(-F // Fg)
    F_pad = G * Fg
    pad = F_pad - F

    w1 = (_TWO_PI * weight_1[:, 0, :]).astype(jnp.float32)      # (F, K), 2*pi folded in
    b1 = bias_1[:, 0, :].astype(jnp.float32)                    # (F, K)
    w2 = weight_2.astype(jnp.float32)                           # (F, K, H)
    b2 = bias_2[:, 0, :].astype(jnp.float32)                    # (F, H)
    if pad:
        w1 = jnp.pad(w1, ((0, pad), (0, 0)))
        b1 = jnp.pad(b1, ((0, pad), (0, 0)))
        w2 = jnp.pad(w2, ((0, pad), (0, 0), (0, 0)))
        b2 = jnp.pad(b2, ((0, pad), (0, 0)))

    w1_g = w1.reshape(G, 1, Fg * K)
    b1_g = b1.reshape(G, 1, Fg * K)
    b2_g = b2.reshape(G, 1, Fg * H)
    # Per-group block-diagonal W2: (G, Fg*K, Fg*H).  Only a Fg x blow-up (not F x).
    eye = jnp.eye(Fg, dtype=jnp.float32)
    w2_g = (eye[None, :, None, :, None]
            * w2.reshape(G, Fg, K, H)[:, :, :, None, :]).reshape(G, Fg * K, Fg * H)
    w2_g = w2_g.astype(weights_dtype)

    meta = dict(n_features=F, n_frequencies=K, hidden=H,
                group_size=Fg, num_groups=G, n_features_padded=F_pad,
                weights_dtype=weights_dtype)
    return (w1_g, b1_g, w2_g, b2_g), meta


# ---------------------------------------------------------------------------
# Forward
# ---------------------------------------------------------------------------
def pbld_apply(x, params, meta, *, plr_act_name="linear", plr_use_densenet=True,
               batch_tile=None):
    if plr_act_name not in ("linear", "relu"):
        raise ValueError(f'Unknown plr_act_name "{plr_act_name}"')
    w1_g, b1_g, w2_g, b2_g = params
    F = meta["n_features"]
    K = meta["n_frequencies"]
    H = meta["hidden"]
    Fg = meta["group_size"]
    G = meta["num_groups"]
    F_pad = meta["n_features_padded"]
    w_itemsize = jnp.dtype(meta["weights_dtype"]).itemsize

    x = x.astype(jnp.float32)
    B = x.shape[0]
    assert x.shape[1] == F, (x.shape, F)

    FgK, FgH = Fg * K, Fg * H
    single_group = (G == 1)
    fuse_densenet = plr_use_densenet and single_group
    emb_width = F * H
    out_width = (emb_width + (F if fuse_densenet else 0)) if single_group else F_pad * H
    out_block_width = out_width if single_group else FgH

    # ---- generation-aware VMEM budget / batch-tile sizing -----------------
    cap = _tpu_vmem_capacity_bytes()
    budget = int(min(96 * 1024 * 1024, (cap * 3) // 4))   # 48 MiB on v7x, 96 MiB on v5e/v6e
    max_tile = 1024 if cap <= 64 * 1024 * 1024 else 2048

    n_wbuf = 1 if single_group else 2
    weight_bytes = n_wbuf * (FgK * FgH * w_itemsize + 4 * (2 * FgK + FgH))
    per_row_bytes = 4 * (2 * FgK                            # x_rep block (2 bufs)
                         + (2 * F if fuse_densenet else 0)  # x pass-through (2 bufs)
                         + 2 * out_block_width              # output block  (2 bufs)
                         + 2 * FgK + FgH)                   # phase / cos / emb live values
    if batch_tile is None:
        avail = max(budget - weight_bytes - (2 << 20), per_row_bytes * 8)
        bt = max(8, min(max_tile, avail // per_row_bytes))
        bt = max(8, (bt // 8) * 8)
        bt = min(bt, _round_up(B, 8))
        # v7x has two TensorCores: keep >= 2 grid steps so megacore sharding helps.
        if cap <= 64 * 1024 * 1024 and G * (_round_up(B, bt) // bt) < 2 and B > 8:
            bt = max(8, _round_up(-(-B // 2), 8))
    else:
        bt = max(8, (int(batch_tile) // 8) * 8)
    B_pad = _round_up(B, bt)
    n_bt = B_pad // bt

    # ---- wrapper-side input prep (x expanded so matmul #1 becomes a VPU op) -
    xb = x if B_pad == B else jnp.pad(x, ((0, B_pad - B), (0, 0)))
    xf = xb if F_pad == F else jnp.pad(xb, ((0, 0), (0, F_pad - F)))
    x_rep = jnp.repeat(xf, K, axis=1).reshape(B_pad, G, FgK).transpose(1, 0, 2)

    operands = [x_rep, w1_g, b1_g, w2_g, b2_g]
    if fuse_densenet:
        operands.append(xb)

    try:
        cost = pl.CostEstimate(
            flops=int(2 * B_pad * F_pad * K * (H + 1)),
            transcendentals=int(B_pad * F_pad * K),
            bytes_accessed=int(4 * (x_rep.size + (xb.size if fuse_densenet else 0)
                                    + w1_g.size + b1_g.size + b2_g.size
                                    + B_pad * out_width)
                               + w_itemsize * w2_g.size))
    except Exception:
        cost = None

    def _run(use_buffered, concat_store):
        def wspec(shape, imap):
            # Resident (constant-index) weights: single-buffer to halve their VMEM.
            if use_buffered and single_group:
                try:
                    return pl.BlockSpec(shape, imap, pipeline_mode=pl.Buffered(1))
                except Exception:
                    return pl.BlockSpec(shape, imap)
            return pl.BlockSpec(shape, imap)

        if single_group:
            grid = (n_bt,)
            in_specs = [
                pl.BlockSpec((None, bt, FgK), lambda i: (0, i, 0)),   # x_rep
                wspec((None, 1, FgK), lambda i: (0, 0, 0)),           # 2*pi*W1
                wspec((None, 1, FgK), lambda i: (0, 0, 0)),           # b1
                wspec((None, FgK, FgH), lambda i: (0, 0, 0)),         # block-diag W2
                wspec((None, 1, FgH), lambda i: (0, 0, 0)),           # b2
            ]
            if fuse_densenet:
                in_specs.append(pl.BlockSpec((bt, F), lambda i: (i, 0)))
            out_spec = pl.BlockSpec((bt, out_width), lambda i: (i, 0))
            dim_sem = ("parallel",)
        else:
            # Groups OUTER so each group's weights are DMA'd once, not per batch tile.
            grid = (G, n_bt)
            in_specs = [
                pl.BlockSpec((None, bt, FgK), lambda g, i: (g, i, 0)),
                pl.BlockSpec((None, 1, FgK), lambda g, i: (g, 0, 0)),
                pl.BlockSpec((None, 1, FgK), lambda g, i: (g, 0, 0)),
                pl.BlockSpec((None, FgK, FgH), lambda g, i: (g, 0, 0)),
                pl.BlockSpec((None, 1, FgH), lambda g, i: (g, 0, 0)),
            ]
            out_spec = pl.BlockSpec((bt, FgH), lambda g, i: (i, g))
            dim_sem = ("parallel", "parallel")

        kernel = functools.partial(_pbld_kernel,
                                   use_relu=(plr_act_name == "relu"),
                                   fuse_densenet=fuse_densenet,
                                   concat_store=concat_store)
        return pl.pallas_call(
            kernel,
            out_shape=jax.ShapeDtypeStruct((B_pad, out_width), jnp.float32),
            grid_spec=pltpu.PrefetchScalarGridSpec(
                num_scalar_prefetch=0,
                grid=grid,
                in_specs=in_specs,
                out_specs=out_spec,
            ),
            compiler_params=pltpu.CompilerParams(
                dimension_semantics=dim_sem,
                vmem_limit_bytes=budget),
            cost_estimate=cost,
        )(*operands)

    try:
        out = _run(True, True)
    except Exception:
        # Conservative fallback (default buffering, split sub-block stores) in case
        # Buffered(1) / minor-dim concatenate are unavailable in this jax build.
        out = _run(False, False)

    if B_pad != B:
        out = out[:B]
    if single_group:
        return out                      # densenet already fused; F_pad == F here
    emb = out if F_pad == F else out[:, :emb_width]
    if plr_use_densenet:
        # TODO(synk): fuse this concat in-kernel via a resident full-width output
        # block (needs dynamic lane-offset stores) to save one HBM pass on y.
        emb = jnp.concatenate([emb, x], axis=-1)
    return emb


def pbld_embeddings(x, weight_1, bias_1, weight_2, bias_2, *,
                    plr_act_name="linear", plr_use_densenet=True,
                    group_size=None, weights_dtype=jnp.float32, batch_tile=None):
    """Convenience one-shot API.  For repeated forwards, call
    prepare_pbld_params(...) once and reuse it with pbld_apply(...)."""
    params, meta = prepare_pbld_params(weight_1, bias_1, weight_2, bias_2,
                                       group_size=group_size,
                                       weights_dtype=weights_dtype)
    return pbld_apply(x, params, meta, plr_act_name=plr_act_name,
                      plr_use_densenet=plr_use_densenet, batch_tile=batch_tile)


# ---------------------------------------------------------------------------
# Pure-JAX reference + parameter init (for the self-test)
# ---------------------------------------------------------------------------
def pbld_reference(x, w1, b1, w2, b2, plr_act_name="linear", plr_use_densenet=True):
    xt = jnp.swapaxes(x, -1, -2)[..., None]        # (F, B, 1)
    z = 2.0 * jnp.pi * jnp.matmul(xt, w1) + b1     # (F, B, K)
    z = jnp.cos(z)
    z = jnp.matmul(z, w2) + b2                     # (F, B, H)
    if plr_act_name == "relu":
        z = jnp.maximum(z, 0.0)
    z = jnp.swapaxes(z, -2, -3)                    # (B, F, H)
    z = z.reshape(*z.shape[:-2], z.shape[-2] * z.shape[-1])
    if plr_use_densenet:
        z = jnp.concatenate([z, x], axis=-1)
    return z


def init_params(key, n_features, n_frequencies, frequency_scale, d_embedding,
                plr_use_densenet=True):
    hidden_2 = d_embedding - 1 if plr_use_densenet else d_embedding
    k1, k2, k3, k4 = jax.random.split(key, 4)
    weight_1 = frequency_scale * jax.random.normal(
        k1, (n_features, 1, n_frequencies), jnp.float32)
    weight_2 = (jax.random.uniform(
        k2, (n_features, n_frequencies, hidden_2), jnp.float32,
        minval=-1.0, maxval=1.0) / math.sqrt(n_frequencies))
    bias_1 = math.pi * jax.random.uniform(
        k3, (n_features, 1, n_frequencies), jnp.float32, minval=-1.0, maxval=1.0)
    bias_2 = (jax.random.uniform(
        k4, (n_features, 1, hidden_2), jnp.float32,
        minval=-1.0, maxval=1.0) / math.sqrt(n_frequencies))
    return weight_1, bias_1, weight_2, bias_2


if __name__ == "__main__":
    key = jax.random.PRNGKey(0)
    kx1, kx2, kp1, kp2, kp3 = jax.random.split(key, 5)

    # Case 1: linear + densenet (hidden = d_embedding - 1 = 7), fused single group.
    B, F, K, d_emb = 8, 4, 16, 8
    x = jax.random.normal(kx1, (B, F), jnp.float32)
    w1, b1, w2, b2 = init_params(kp1, F, K, 0.1, d_emb, plr_use_densenet=True)
    y = jax.block_until_ready(pbld_embeddings(
        x, w1, b1, w2, b2, plr_act_name="linear", plr_use_densenet=True))
    y_ref = pbld_reference(x, w1, b1, w2, b2, "linear", True)
    assert y.shape == (B, F * (d_emb - 1) + F), y.shape
    assert jnp.allclose(y, y_ref, atol=2e-5, rtol=2e-5), \
        float(jnp.max(jnp.abs(y - y_ref)))

    # Case 2: relu, no densenet (hidden = d_embedding = 8).
    w1b, b1b, w2b, b2b = init_params(kp2, F, K, 0.1, d_emb, plr_use_densenet=False)
    y2 = jax.block_until_ready(pbld_embeddings(
        x, w1b, b1b, w2b, b2b, plr_act_name="relu", plr_use_densenet=False))
    y2_ref = pbld_reference(x, w1b, b1b, w2b, b2b, "relu", False)
    assert y2.shape == (B, F * d_emb), y2.shape
    assert jnp.allclose(y2, y2_ref, atol=2e-5, rtol=2e-5), \
        float(jnp.max(jnp.abs(y2 - y2_ref)))

    # Case 3: forced feature-group-blocked path (G=2) + relu + densenet.
    B3, F3, K3, d_emb3 = 24, 32, 8, 9
    x3 = jax.random.normal(kx2, (B3, F3), jnp.float32)
    w1c, b1c, w2c, b2c = init_params(kp3, F3, K3, 0.1, d_emb3, plr_use_densenet=True)
    y3 = jax.block_until_ready(pbld_embeddings(
        x3, w1c, b1c, w2c, b2c, plr_act_name="relu", plr_use_densenet=True,
        group_size=16))
    y3_ref = pbld_reference(x3, w1c, b1c, w2c, b2c, "relu", True)
    assert y3.shape == (B3, F3 * (d_emb3 - 1) + F3), y3.shape
    assert jnp.allclose(y3, y3_ref, atol=2e-5, rtol=2e-5), \
        float(jnp.max(jnp.abs(y3 - y3_ref)))

    # Case 4: bf16 W2 / cos(phase) for the MXU matmul (f32 accumulate).
    y4 = jax.block_until_ready(pbld_embeddings(
        x, w1, b1, w2, b2, plr_act_name="linear", plr_use_densenet=True,
        weights_dtype=jnp.bfloat16))
    assert y4.shape == y_ref.shape, y4.shape
    assert jnp.allclose(y4, y_ref, atol=5e-2, rtol=5e-2), \
        float(jnp.max(jnp.abs(y4 - y_ref)))

    print("KERNEL_OK")
</pallas_src>

<mosaic_0001>
module attributes {stable_mosaic.version = 11 : i64} {
  func.func @_pbld_kernel(%arg0: i32, %arg1: memref<1x8x64xf32, #tpu.memory_space<vmem>>, %arg2: memref<1x1x64xf32, #tpu.memory_space<vmem>>, %arg3: memref<1x1x64xf32, #tpu.memory_space<vmem>>, %arg4: memref<1x64x28xf32, #tpu.memory_space<vmem>>, %arg5: memref<1x1x28xf32, #tpu.memory_space<vmem>>, %arg6: memref<8x4xf32, #tpu.memory_space<vmem>>, %arg7: memref<8x32xf32, #tpu.memory_space<vmem>>) attributes {dimension_semantics = [#tpu.dimension_semantics<parallel>], iteration_bounds = array<i64: 1>, scalar_prefetch = 0 : i64, scratch_operands = 0 : i64, tpu.core_type = #tpu.core_type<tc>, window_params = [{transform_indices = @transform_0, window_bounds = array<i64: 1, 8, 64>}, {pipeline_mode = #tpu.pipeline_mode<synchronous>, transform_indices = @transform_1, window_bounds = array<i64: 1, 1, 64>}, {pipeline_mode = #tpu.pipeline_mode<synchronous>, transform_indices = @transform_2, window_bounds = array<i64: 1, 1, 64>}, {pipeline_mode = #tpu.pipeline_mode<synchronous>, transform_indices = @transform_3, window_bounds = array<i64: 1, 64, 28>}, {pipeline_mode = #tpu.pipeline_mode<synchronous>, transform_indices = @transform_4, window_bounds = array<i64: 1, 1, 28>}, {transform_indices = @transform_5, window_bounds = array<i64: 8, 4>}, {transform_indices = @transform_6, window_bounds = array<i64: 8, 32>}]} {
    %c0 = arith.constant 0 : index
    %c0_0 = arith.constant 0 : index
    %c0_1 = arith.constant 0 : index
    %0 = vector.load %arg1[%c0, %c0_0, %c0_1] : memref<1x8x64xf32, #tpu.memory_space<vmem>>, vector<1x8x64xf32>
    %1 = vector.shape_cast %0 : vector<1x8x64xf32> to vector<8x64xf32>
    %c0_2 = arith.constant 0 : index
    %c0_3 = arith.constant 0 : index
    %c0_4 = arith.constant 0 : index
    %2 = vector.load %arg2[%c0_2, %c0_3, %c0_4] : memref<1x1x64xf32, #tpu.memory_space<vmem>>, vector<1x1x64xf32>
    %3 = vector.shape_cast %2 : vector<1x1x64xf32> to vector<1x64xf32>
    %4 = vector.broadcast %3 : vector<1x64xf32> to vector<8x64xf32>
    %5 = arith.mulf %1, %4 : vector<8x64xf32>
    %c0_5 = arith.constant 0 : index
    %c0_6 = arith.constant 0 : index
    %c0_7 = arith.constant 0 : index
    %6 = vector.load %arg3[%c0_5, %c0_6, %c0_7] : memref<1x1x64xf32, #tpu.memory_space<vmem>>, vector<1x1x64xf32>
    %7 = vector.shape_cast %6 : vector<1x1x64xf32> to vector<1x64xf32>
    %8 = vector.broadcast %7 : vector<1x64xf32> to vector<8x64xf32>
    %9 = arith.addf %5, %8 : vector<8x64xf32>
    %10 = math.cos %9 : vector<8x64xf32>
    %c0_8 = arith.constant 0 : index
    %c0_9 = arith.constant 0 : index
    %c0_10 = arith.constant 0 : index
    %11 = vector.load %arg4[%c0_8, %c0_9, %c0_10] : memref<1x64x28xf32, #tpu.memory_space<vmem>>, vector<1x64x28xf32>
    %12 = vector.shape_cast %11 : vector<1x64x28xf32> to vector<64x28xf32>
    %cst = arith.constant dense<0.000000e+00> : vector<8x28xf32>
    %13 = tpu.matmul %10, %12, %cst {dimension_numbers = #tpu.dot_dimension_numbers<[1], [0], [0], [1], [0, 0, 1, 1], [], []>} : vector<8x64xf32>, vector<64x28xf32>, vector<8x28xf32> -> vector<8x28xf32>
    %c0_11 = arith.constant 0 : index
    %c0_12 = arith.constant 0 : index
    %c0_13 = arith.constant 0 : index
    %14 = vector.load %arg5[%c0_11, %c0_12, %c0_13] : memref<1x1x28xf32, #tpu.memory_space<vmem>>, vector<1x1x28xf32>
    %15 = vector.shape_cast %14 : vector<1x1x28xf32> to vector<1x28xf32>
    %16 = vector.broadcast %15 : vector<1x28xf32> to vector<8x28xf32>
    %17 = arith.addf %13, %16 : vector<8x28xf32>
    %c0_14 = arith.constant 0 : index
    %c0_15 = arith.constant 0 : index
    %18 = vector.load %arg6[%c0_14, %c0_15] : memref<8x4xf32, #tpu.memory_space<vmem>>, vector<8x4xf32>
    %19 = tpu.concatenate %17, %18 in 1 : vector<8x28xf32>, vector<8x4xf32> -> vector<8x32xf32>
    %c0_16 = arith.constant 0 : index
    %c0_17 = arith.constant 0 : index
    %20 = vector.load %arg7[%c0_16, %c0_17] : memref<8x32xf32, #tpu.memory_space<vmem>>, vector<8x32xf32>
    tpu.vector_store %arg7[%c0_16, %c0_17], %19 {strides = array<i32>} : memref<8x32xf32, #tpu.memory_space<vmem>>, vector<8x32xf32>,
    return
  }
  func.func @transform_0(%arg0: i32) -> (i32, i32, i32) {
    %c0_i32 = arith.constant 0 : i32
    %c0_i32_0 = arith.constant 0 : i32
    %c0_i32_1 = arith.constant 0 : i32
    return %c0_i32, %arg0, %c0_i32_0 : i32, i32, i32
  }
  func.func @transform_1(%arg0: i32) -> (i32, i32, i32) {
    %c0_i32 = arith.constant 0 : i32
    %c0_i32_0 = arith.constant 0 : i32
    %c0_i32_1 = arith.constant 0 : i32
    %c0_i32_2 = arith.constant 0 : i32
    return %c0_i32, %c0_i32_0, %c0_i32_1 : i32, i32, i32
  }
  func.func @transform_2(%arg0: i32) -> (i32, i32, i32) {
    %c0_i32 = arith.constant 0 : i32
    %c0_i32_0 = arith.constant 0 : i32
    %c0_i32_1 = arith.constant 0 : i32
    %c0_i32_2 = arith.constant 0 : i32
    return %c0_i32, %c0_i32_0, %c0_i32_1 : i32, i32, i32
  }
  func.func @transform_3(%arg0: i32) -> (i32, i32, i32) {
    %c0_i32 = arith.constant 0 : i32
    %c0_i32_0 = arith.constant 0 : i32
    %c0_i32_1 = arith.constant 0 : i32
    %c0_i32_2 = arith.constant 0 : i32
    return %c0_i32, %c0_i32_0, %c0_i32_1 : i32, i32, i32
  }
  func.func @transform_4(%arg0: i32) -> (i32, i32, i32) {
    %c0_i32 = arith.constant 0 : i32
    %c0_i32_0 = arith.constant 0 : i32
    %c0_i32_1 = arith.constant 0 : i32
    %c0_i32_2 = arith.constant 0 : i32
    return %c0_i32, %c0_i32_0, %c0_i32_1 : i32, i32, i32
  }
  func.func @transform_5(%arg0: i32) -> (i32, i32) {
    %c0_i32 = arith.constant 0 : i32
    %c0_i32_0 = arith.constant 0 : i32
    return %arg0, %c0_i32 : i32, i32
  }
  func.func @transform_6(%arg0: i32) -> (i32, i32) {
    %c0_i32 = arith.constant 0 : i32
    %c0_i32_0 = arith.constant 0 : i32
    return %arg0, %c0_i32 : i32, i32
  }
}

module attributes {stable_mosaic.version = 11 : i64} {
  func.func @_pbld_kernel(%arg0: i32, %arg1: memref<1x8x64xf32, #tpu.memory_space<vmem>>, %arg2: memref<1x1x64xf32, #tpu.memory_space<vmem>>, %arg3: memref<1x1x64xf32, #tpu.memory_space<vmem>>, %arg4: memref<1x64x28xf32, #tpu.memory_space<vmem>>, %arg5: memref<1x1x28xf32, #tpu.memory_space<vmem>>, %arg6: memref<8x4xf32, #tpu.memory_space<vmem>>, %arg7: memref<8x32xf32, #tpu.memory_space<vmem>>) attributes {dimension_semantics = [#tpu.dimension_semantics<parallel>], iteration_bounds = array<i64: 1>, scalar_prefetch = 0 : i64, scratch_operands = 0 : i64, tpu.core_type = #tpu.core_type<tc>, window_params = [{transform_indices = @transform_0, window_bounds = array<i64: 1, 8, 64>}, {pipeline_mode = #tpu.pipeline_mode<synchronous>, transform_indices = @transform_1, window_bounds = array<i64: 1, 1, 64>}, {pipeline_mode = #tpu.pipeline_mode<synchronous>, transform_indices = @transform_2, window_bounds = array<i64: 1, 1, 64>}, {pipeline_mode = #tpu.pipeline_mode<synchronous>, transform_indices = @transform_3, window_bounds = array<i64: 1, 64, 28>}, {pipeline_mode = #tpu.pipeline_mode<synchronous>, transform_indices = @transform_4, window_bounds = array<i64: 1, 1, 28>}, {transform_indices = @transform_5, window_bounds = array<i64: 8, 4>}, {transform_indices = @transform_6, window_bounds = array<i64: 8, 32>}]} {
    %c0 = arith.constant 0 : index
    %c0_0 = arith.constant 0 : index
    %c0_1 = arith.constant 0 : index
    %0 = vector.load %arg1[%c0, %c0_0, %c0_1] : memref<1x8x64xf32, #tpu.memory_space<vmem>>, vector<1x8x64xf32>
    %1 = vector.shape_cast %0 : vector<1x8x64xf32> to vector<8x64xf32>
    %c0_2 = arith.constant 0 : index
    %c0_3 = arith.constant 0 : index
    %c0_4 = arith.constant 0 : index
    %2 = vector.load %arg2[%c0_2, %c0_3, %c0_4] : memref<1x1x64xf32, #tpu.memory_space<vmem>>, vector<1x1x64xf32>
    %3 = vector.shape_cast %2 : vector<1x1x64xf32> to vector<1x64xf32>
    %4 = vector.broadcast %3 : vector<1x64xf32> to vector<8x64xf32>
    %5 = arith.mulf %1, %4 : vector<8x64xf32>
    %c0_5 = arith.constant 0 : index
    %c0_6 = arith.constant 0 : index
    %c0_7 = arith.constant 0 : index
    %6 = vector.load %arg3[%c0_5, %c0_6, %c0_7] : memref<1x1x64xf32, #tpu.memory_space<vmem>>, vector<1x1x64xf32>
    %7 = vector.shape_cast %6 : vector<1x1x64xf32> to vector<1x64xf32>
    %8 = vector.broadcast %7 : vector<1x64xf32> to vector<8x64xf32>
    %9 = arith.addf %5, %8 : vector<8x64xf32>
    %10 = math.cos %9 : vector<8x64xf32>
    %c0_8 = arith.constant 0 : index
    %c0_9 = arith.constant 0 : index
    %c0_10 = arith.constant 0 : index
    %11 = vector.load %arg4[%c0_8, %c0_9, %c0_10] : memref<1x64x28xf32, #tpu.memory_space<vmem>>, vector<1x64x28xf32>
    %12 = vector.shape_cast %11 : vector<1x64x28xf32> to vector<64x28xf32>
    %cst = arith.constant dense<0.000000e+00> : vector<8x28xf32>
    %13 = tpu.matmul %10, %12, %cst {dimension_numbers = #tpu.dot_dimension_numbers<[1], [0], [0], [1], [0, 0, 1, 1], [], []>} : vector<8x64xf32>, vector<64x28xf32>, vector<8x28xf32> -> vector<8x28xf32>
    %c0_11 = arith.constant 0 : index
    %c0_12 = arith.constant 0 : index
    %c0_13 = arith.constant 0 : index
    %14 = vector.load %arg5[%c0_11, %c0_12, %c0_13] : memref<1x1x28xf32, #tpu.memory_space<vmem>>, vector<1x1x28xf32>
    %15 = vector.shape_cast %14 : vector<1x1x28xf32> to vector<1x28xf32>
    %16 = vector.broadcast %15 : vector<1x28xf32> to vector<8x28xf32>
    %17 = arith.addf %13, %16 : vector<8x28xf32>
    %c0_14 = arith.constant 0 : index
    %c0_15 = arith.constant 0 : index
    %18 = vector.load %arg6[%c0_14, %c0_15] : memref<8x4xf32, #tpu.memory_space<vmem>>, vector<8x4xf32>
    %c0_16 = arith.constant 0 : index
    %c0_17 = arith.constant 0 : index
    %19 = vector.load %arg7[%c0_16, %c0_17] : memref<8x32xf32, #tpu.memory_space<vmem>>, vector<8x28xf32>
    tpu.vector_store %arg7[%c0_16, %c0_17], %17 {strides = array<i32>} : memref<8x32xf32, #tpu.memory_space<vmem>>, vector<8x28xf32>,
    %c0_18 = arith.constant 0 : index
    %c28 = arith.constant 28 : index
    %20 = vector.load %arg7[%c0_18, %c28] : memref<8x32xf32, #tpu.memory_space<vmem>>, vector<8x4xf32>
    tpu.vector_store %arg7[%c0_18, %c28], %18 {strides = array<i32>} : memref<8x32xf32, #tpu.memory_space<vmem>>, vector<8x4xf32>,
    return
  }
  func.func @transform_0(%arg0: i32) -> (i32, i32, i32) {
    %c0_i32 = arith.constant 0 : i32
    %c0_i32_0 = arith.constant 0 : i32
    %c0_i32_1 = arith.constant 0 : i32
    return %c0_i32, %arg0, %c0_i32_0 : i32, i32, i32
  }
  func.func @transform_1(%arg0: i32) -> (i32, i32, i32) {
    %c0_i32 = arith.constant 0 : i32
    %c0_i32_0 = arith.constant 0 : i32
    %c0_i32_1 = arith.constant 0 : i32
    %c0_i32_2 = arith.constant 0 : i32
    return %c0_i32, %c0_i32_0, %c0_i32_1 : i32, i32, i32
  }
  func.func @transform_2(%arg0: i32) -> (i32, i32, i32) {
    %c0_i32 = arith.constant 0 : i32
    %c0_i32_0 = arith.constant 0 : i32
    %c0_i32_1 = arith.constant 0 : i32
    %c0_i32_2 = arith.constant 0 : i32
    return %c0_i32, %c0_i32_0, %c0_i32_1 : i32, i32, i32
  }
  func.func @transform_3(%arg0: i32) -> (i32, i32, i32) {
    %c0_i32 = arith.constant 0 : i32
    %c0_i32_0 = arith.constant 0 : i32
    %c0_i32_1 = arith.constant 0 : i32
    %c0_i32_2 = arith.constant 0 : i32
    return %c0_i32, %c0_i32_0, %c0_i32_1 : i32, i32, i32
  }
  func.func @transform_4(%arg0: i32) -> (i32, i32, i32) {
    %c0_i32 = arith.constant 0 : i32
    %c0_i32_0 = arith.constant 0 : i32
    %c0_i32_1 = arith.constant 0 : i32
    %c0_i32_2 = arith.constant 0 : i32
    return %c0_i32, %c0_i32_0, %c0_i32_1 : i32, i32, i32
  }
  func.func @transform_5(%arg0: i32) -> (i32, i32) {
    %c0_i32 = arith.constant 0 : i32
    %c0_i32_0 = arith.constant 0 : i32
    return %arg0, %c0_i32 : i32, i32
  }
  func.func @transform_6(%arg0: i32) -> (i32, i32) {
    %c0_i32 = arith.constant 0 : i32
    %c0_i32_0 = arith.constant 0 : i32
    return %arg0, %c0_i32 : i32, i32
  }
}

</mosaic_0001>

<bundles_post_ra>
// kernel: tpu_custom_call.1
= control target key start
LH: loop header
LB: loop body
LE: loop exit
PB: predicated region body
PF: predicated region fallthrough
CT: control target
= control target key end

     0   :  { %v347_v3 = vmov 0.0|0.0   ;;  %vm348_vm0 = vmmov 0   ;;  %v349_v6 = vmov 0.0   ;;  %s465_s0 = inlined_call_operand.vmem [shape: f32[1,8,64], index: 0, kind: input, shape index: {}]   ;;  %s466_s1 = inlined_call_operand.vmem [shape: f32[1,1,64], index: 1, kind: input, shape index: {}]   ;;  %s467_s2 = inlined_call_operand.vmem [shape: f32[1,1,64], index: 2, kind: input, shape index: {}]   ;;  %s468_s3 = inlined_call_operand.vmem [shape: f32[1,64,28], index: 3, kind: input, shape index: {}]   ;;  %s469_s4 = inlined_call_operand.vmem [shape: f32[1,1,28], index: 4, kind: input, shape index: {}]   ;;  %s470_s5 = inlined_call_operand.vmem [shape: f32[8,4], index: 5, kind: input, shape index: {}]   ;;  %s471_s6 = inlined_call_operand.hbm [shape: f32[8,32], index: 6, kind: output, shape index: {}]  }
   0x1   :  { %v144_v0 = vld [vmem:[%s468_s3] sm:$0xff]  ;;  %v145_v1 = vld [vmem:[%s468_s3 + $0x8] sm:$0xff]  ;;  %v146_v2 = vld [vmem:[%s468_s3 + $0x10] sm:$0xff]  ;;  %292 = vmatprep.subr.bf16.mxu0 %v347_v3  ;;  %289 = vmatprep.mubr.msk.f32.mxu0 %vm348_vm0, %v349_v6 }
   0x2   :  { %v293_v4 = vpack.c.bf16 %v145_v1, %v144_v0  ;;  %v147_v5 = vld [vmem:[%s468_s3 + $0x18] sm:$0xff]  ;;  %v24_v7 = vld [vmem:[%s465_s0] sm:$0xff]  ;;  %v149_v12 = vld [vmem:[%s468_s3 + $0x28] sm:$0xff] }
   0x3   :  { %v296_v8 = vpack.c.bf16 %v147_v5, %v146_v2  ;;  %v256_v9 = vld [vmem:[%s466_s1] ss:$0 sm:$0xff] }
   0x4   :  { %294 = vmatpush3.bf16.msra.mxu0 %v293_v4  ;;  %v257_v10 = vld [vmem:[%s467_s2] ss:$0 sm:$0xff]  ;;  %v32_v13 = vmul.f32 %v256_v9, %v24_v7 }
   0x5   :  { %295 = vmatprep.subr.bf16.mxu0 %v347_v3  ;;  %v148_v11 = vld [vmem:[%s468_s3 + $0x20] sm:$0xff] }
   0x6   :  { %v233_v14 = vld [vmem:[%s470_s5] sm:$0xff] }
   0x7   :  { %11 = vsyncpa [#allocation3], 0  ;;  %v423_v15 = vadd.f32 %v257_v10, %v32_v13  ;;  %s350_s1 = smov 28   ;;  %v299_v16 = vpack.c.bf16 %v149_v12, %v148_v11  ;;  %v150_v17 = vld [vmem:[%s468_s3 + $0x30] sm:$0xff]  ;;  %v151_v18 = vld [vmem:[%s468_s3 + $0x38] sm:$0xff]  ;;  %vm159_vm14 = vcmask 523264  }
   0x8   :  { %235 = vrot.lane.b32.xlu0 %v233_v14, %s350_s1  ;;  %297 = vmatpush3.bf16.msra.mxu0 %v296_v8  ;;  %v302_v21 = vpack.c.bf16 %v151_v18, %v150_v17  ;;  %v351_v31 = vmov 683565275   ;;  %v352_v33 = vmov 2475754826   ;;  %v353_v35 = vmov 2131351028  }
   0x9   :  { %298 = vmatprep.subr.bf16.mxu0 %v347_v3  ;;  %v44_v19 = vand.u32 2139095040, %v423_v15  ;;  %v41_v22 = vand.u32 2147483647, %v423_v15  ;;  %v354_v37 = vmov 2102212464   ;;  %vm43_vm8 = vcmp.lt.s32.totalorder %v423_v15, 0 }
   0xa   :  { %v355_v39 = vmov 920167782   ;;  %v356_v46 = vmov 1326507024   ;;  %vm133_vm13 = vweird.f32 %v423_v15  ;;  %s357_s19 = smov [#allocation2]   ;;  %vm238_vm15 = vcmask 228352  }
   0xb   :  { %v45_v20 = vshrl.u32 %v44_v19, 23  ;;  %v48_v25 = vand.u32 8388607, %v41_v22  ;;  %vm42_vm9 = vcmp.le.f32.partialorder %v41_v22, 0.7853982  ;;  %s248_s20 = sshll.u32 %s357_s19, 4  ;;  %s249_s20 = int_to_ptr.vmem [resolvable:$true] %s248_s20 }
   0xc   :  { %300 = vmatpush3.bf16.msra.mxu0 %v299_v16  ;;  %vm240_vm0 = vcmask 261120   ;;  %s323_s21 = scalar_lea.vmem %s249_s20, 128  ;;  %p328_p1 = scmp.lt.s32.totalorder %s249_s20, %s249_s20 }
   0xd   :  { %301 = vmatprep.subr.bf16.mxu0 %v347_v3  ;;  %v258_v23 = vadd.s32 4294967169, %v45_v20  ;;  %v49_v28 = vor.u32 8388608, %v48_v25  ;;  %p324_p0 = scmp.ne.s32.totalorder %s249_s20, %s323_s21  ;;  %p329_p2 = scmp.lt.s32.totalorder %s323_s21, %s323_s21 }
   0xf   :  { %v51_v24 = vadd.s32 1, %v258_v23  ;;  %v89_v48 = vshll.u32 %v49_v28, 8  ;;  %p330_p3 = por %p329_p2, %p328_p1 }
  0x10   :  { %303 = vmatpush3.bf16.msra.mxu0 %v302_v21 }
  0x11   :  { %vm52_vm1 = vcmp.gt.s32.totalorder %v51_v24, 0  ;;  %p331_p4 = pnand %p330_p3, %p324_p0 }
  0x12   :  { %v53_v26 = vsel %vm52_vm1, %v51_v24, 0 }
  0x13   :  { %v55_v27 = vand.u32 31, %v53_v26  ;;  %v54_v29 = vshrl.u32 %v53_v26, 5 }
  0x15   :  { %v56_v30 = vsub.s32 32, %v55_v27  ;;  %v58_v32 = vshll.u32 %v351_v31, %v55_v27  ;;  %v61_v34 = vshll.u32 %v352_v33, %v55_v27  ;;  %v64_v36 = vshll.u32 %v353_v35, %v55_v27 }
  0x16   :  { %v67_v38 = vshll.u32 %v354_v37, %v55_v27  ;;  %v70_v40 = vshll.u32 %v355_v39, %v55_v27  ;;  %vm73_vm2 = vcmp.lt.s32.totalorder %v54_v29, 1  ;;  %vm76_vm3 = vcmp.lt.s32.totalorder %v54_v29, 4 }
  0x17   :  { %v57_v41 = vshrl.u32 %v351_v31, %v56_v30  ;;  %v59_v42 = vshrl.u32 %v352_v33, %v56_v30  ;;  %v62_v43 = vshrl.u32 %v353_v35, %v56_v30  ;;  %v65_v44 = vshrl.u32 %v354_v37, %v56_v30 }
  0x18   :  { %v68_v45 = vshrl.u32 %v355_v39, %v56_v30  ;;  %v71_v47 = vshrl.u32 %v356_v46, %v56_v30  ;;  %vm74_vm4 = vcmp.lt.s32.totalorder %v54_v29, 2  ;;  %vm75_vm5 = vcmp.lt.s32.totalorder %v54_v29, 3 }
  0x19   :  { %v60_v49 = vor.u32 %v59_v42, %v58_v32  ;;  %v63_v50 = vor.u32 %v62_v43, %v61_v34  ;;  %v66_v51 = vor.u32 %v65_v44, %v64_v36 }
  0x1a   :  { %v69_v52 = vor.u32 %v68_v45, %v67_v38  ;;  %v72_v53 = vor.u32 %v71_v47, %v70_v40  ;;  %v262_v47 = vld [vmem:[%s469_s4] ss:$0 sm:$0xff] }
  0x1b   :  { %v77_v54 = vsel %vm73_vm2, %v57_v41, %v60_v49  ;;  %v78_v55 = vsel %vm76_vm3, %v66_v51, 2102212464  ;;  %v81_v56 = vsel %vm73_vm2, %v60_v49, %v63_v50  ;;  %v85_v57 = vsel %vm73_vm2, %v63_v50, %v66_v51 }
  0x1c   :  { %v79_v58 = vsel %vm75_vm5, %v63_v50, %v78_v55  ;;  %v82_v59 = vsel %vm76_vm3, %v69_v52, 920167782  ;;  %v86_v60 = vsel %vm76_vm3, %v72_v53, 1326507024 }
  0x1d   :  { %v83_v61 = vsel %vm75_vm5, %v66_v51, %v82_v59  ;;  %v87_v62 = vsel %vm75_vm5, %v69_v52, %v86_v60  ;;  %v80_v63 = vsel %vm74_vm4, %v77_v54, %v79_v58 }
  0x1e   :  { %v84_v0 = vsel %vm74_vm4, %v81_v56, %v83_v61  ;;  %v88_v1 = vsel %vm74_vm4, %v85_v57, %v87_v62  ;;  %v96_v6 = vmul.u32 %v89_v48, %v80_v63 }
  0x1f   :  { %v435_v2 = vmul.u32.u64.low %v89_v48, %v88_v1  ;;  %v436_v3 = vmul.u32.u64.high %v89_v48, %v88_v1, %v435_v2  ;;  %v438_v4 = vmul.u32.u64.low %v89_v48, %v84_v0  ;;  %v439_v5 = vmul.u32.u64.high %v89_v48, %v84_v0, %v438_v4 }
  0x21   :  { %vm98_vm6 = vc.u32 %v436_v3, %v438_v4  ;;  %v99_v7 = vadd.s32 1, %v439_v5  ;;  %v97_v19 = vadd.s32 %v438_v4, %v436_v3 }
  0x23   :  { %v100_v8 = vsel %vm98_vm6, %v99_v7, %v439_v5 }
  0x24   :  { %v101_v9 = vadd.s32 %v100_v8, %v96_v6 }
  0x26   :  { %v102_v10 = vadd.s32 536870912, %v101_v9 }
  0x28   :  { %v103_v11 = vshrl.u32 %v102_v10, 30 }
  0x2a   :  { %v104_v12 = vshll.u32 %v103_v11, 30  ;;  %v127_v34 = vsub.s32 4, %v103_v11 }
  0x2c   :  { %v105_v13 = vsub.s32 %v101_v9, %v104_v12  ;;  %v128_v37 = vsel %vm43_vm8, %v127_v34, %v103_v11 }
  0x2d   :  { %v130_v38 = vsel %vm42_vm9, 0, %v128_v37 }
  0x2e   :  { %v107_v14 = vsub.s32 0, %v105_v13  ;;  %v134_v39 = vand.u32 3, %v130_v38 }
  0x30   :  { %v259_v16 = vmin.u32 %v107_v14, %v105_v13  ;;  %vm139_vm10 = vcmp.eq.s32.totalorder %v134_v39, 2  ;;  %vm136_vm11 = vcmp.eq.s32.totalorder %v134_v39, 0  ;;  %vm135_vm12 = vcmp.lt.s32.totalorder %v134_v39, 2 }
  0x32   :  { %v109_v17 = vclz %v259_v16 }
  0x34   :  { %v260_v18 = vadd.s32 4294967294, %v109_v17 }
  0x36   :  { %vm261_vm7 = vcmp.lt.s32.totalorder %v260_v18, 0 }
  0x37   :  { %v112_v20 = vsel %vm261_vm7, 0, %v260_v18 }
  0x38   :  { %v113_v21 = vsub.s32 32, %v112_v20  ;;  %v114_v23 = vshll.u32 %v105_v13, %v112_v20  ;;  %v117_v24 = vsub.s32 4294967266, %v112_v20 }
  0x3a   :  { %v115_v25 = vshrl.u32 %v97_v19, %v113_v21  ;;  %v118_v26 = vadd.s32 127, %v117_v24 }
  0x3c   :  { %v116_v27 = vor.u32 %v115_v25, %v114_v23  ;;  %v119_v28 = vshll.u32 %v118_v26, 23 }
  0x3e   :  { %v120_v29 = vor.u32 4788187, %v119_v28  ;;  %v123_v30 = vcvt.s32.f32 %v116_v27 }
  0x40   :  { %v121_v31 = vand.u32 2147483647, %v120_v29 }
  0x42   :  { %v124_v32 = vmul.f32 %v123_v30, %v121_v31 }
  0x44   :  { %v125_v33 = vxor.u32 2147483648, %v124_v32 }
  0x46   :  { %v126_v35 = vsel %vm43_vm8, %v125_v33, %v124_v32 }
  0x47   :  { %v129_v36 = vsel %vm42_vm9, %v423_v15, %v126_v35 }
  0x48   :  { %319 = vcosq.f32 %v129_v36 }
  0x49   :  { %321 = vsinq.f32 %v129_v36 }
  0x52   :  { %v320_v40 = vpop.eup %319 }
  0x53   :  { %v322_v41 = vpop.eup %321  ;;  %v140_v42 = vxor.u32 2147483648, %v320_v40 }
  0x54   :  { %v137_v43 = vxor.u32 2147483648, %v322_v41 }
  0x55   :  { %v141_v22 = vsel %vm139_vm10, %v140_v42, %v322_v41 }
  0x56   :  { %v138_v44 = vsel %vm136_vm11, %v320_v40, %v137_v43 }
  0x57   :  { %v142_v45 = vsel %vm135_vm12, %v138_v44, %v141_v22 }
  0x58   :  { %v143_v46 = vsel %vm133_vm13, nan, %v142_v45 }
  0x59   :  { %290 = vmatmul.mubr.msk.f32.vlgmr.msra.gmra.mrb[0].mxu0 %vm159_vm14, %v143_v46 }
  0x7a   :  { %v236_v49 = vpop.permute.xlu0 %235 }
 0x12c   :  { %v229_v48 = vpop.f32.mrb[0].mxu0 }
 0x12d   :  { %v230_v50 = vadd.f32 %v262_v47, %v229_v48  ;;  %v291_v51 = vpop.f32.mrb[1].mxu0 }
 0x12f   :  { %v239_v15 = vsel %vm238_vm15, %v230_v50, %v236_v49 }
 0x130   :  { %241 = vst.msk [vmem:[#allocation2] sm:$0xff] %vm240_vm0, %v239_v15 }
 0x131   :  { %334 = shalt.err (!%p331_p4)
}
 0x132   :  { %s335_s23 = scalar_lea.hbm %s471_s6, 128 }
 0x133   :  { %p336_p5 = scmp.ne.s32.totalorder %s471_s6, %s335_s23  ;;  %p339_p6 = scmp.lt.u32.totalorder %s335_s23, %s471_s6 }
 0x135   :  { %p341_p7 = pnand %p339_p6, %p336_p5 }
 0x137   :  { %344 = shalt.err (!%p341_p7)
}
 0x138   :  { %251 = dma.vmem_to_hbm [thread:$0]  %s249_s20, 128, %s471_s6, [#allocation3]  }
 0x139   :  { %345 = dma.done.wait [#allocation3], 128  }
 0x13a   :  { %346 = vsyncadd [#allocation3], 4294967168 }
 0x13b   :  { %255 = vsyncpa [#allocation3], 1 }

// kernel: tpu_custom_call.1
= control target key start
LH: loop header
LB: loop body
LE: loop exit
PB: predicated region body
PF: predicated region fallthrough
CT: control target
= control target key end

     0   :  { %v347_v3 = vmov 0.0|0.0   ;;  %vm348_vm0 = vmmov 0   ;;  %v349_v6 = vmov 0.0   ;;  %s465_s0 = inlined_call_operand.vmem [shape: f32[1,8,64], index: 0, kind: input, shape index: {}]   ;;  %s466_s1 = inlined_call_operand.vmem [shape: f32[1,1,64], index: 1, kind: input, shape index: {}]   ;;  %s467_s2 = inlined_call_operand.vmem [shape: f32[1,1,64], index: 2, kind: input, shape index: {}]   ;;  %s468_s3 = inlined_call_operand.vmem [shape: f32[1,64,28], index: 3, kind: input, shape index: {}]   ;;  %s469_s4 = inlined_call_operand.vmem [shape: f32[1,1,28], index: 4, kind: input, shape index: {}]   ;;  %s470_s5 = inlined_call_operand.vmem [shape: f32[8,4], index: 5, kind: input, shape index: {}]   ;;  %s471_s6 = inlined_call_operand.hbm [shape: f32[8,32], index: 6, kind: output, shape index: {}]  }
   0x1   :  { %v144_v0 = vld [vmem:[%s468_s3] sm:$0xff]  ;;  %v145_v1 = vld [vmem:[%s468_s3 + $0x8] sm:$0xff]  ;;  %v146_v2 = vld [vmem:[%s468_s3 + $0x10] sm:$0xff]  ;;  %292 = vmatprep.subr.bf16.mxu0 %v347_v3  ;;  %289 = vmatprep.mubr.msk.f32.mxu0 %vm348_vm0, %v349_v6 }
   0x2   :  { %v293_v4 = vpack.c.bf16 %v145_v1, %v144_v0  ;;  %v147_v5 = vld [vmem:[%s468_s3 + $0x18] sm:$0xff]  ;;  %v24_v7 = vld [vmem:[%s465_s0] sm:$0xff]  ;;  %v149_v12 = vld [vmem:[%s468_s3 + $0x28] sm:$0xff] }
   0x3   :  { %v296_v8 = vpack.c.bf16 %v147_v5, %v146_v2  ;;  %v256_v9 = vld [vmem:[%s466_s1] ss:$0 sm:$0xff] }
   0x4   :  { %294 = vmatpush3.bf16.msra.mxu0 %v293_v4  ;;  %v257_v10 = vld [vmem:[%s467_s2] ss:$0 sm:$0xff]  ;;  %v32_v13 = vmul.f32 %v256_v9, %v24_v7 }
   0x5   :  { %295 = vmatprep.subr.bf16.mxu0 %v347_v3  ;;  %v148_v11 = vld [vmem:[%s468_s3 + $0x20] sm:$0xff] }
   0x6   :  { %v233_v14 = vld [vmem:[%s470_s5] sm:$0xff] }
   0x7   :  { %11 = vsyncpa [#allocation3], 0  ;;  %v423_v15 = vadd.f32 %v257_v10, %v32_v13  ;;  %s350_s1 = smov 28   ;;  %v299_v16 = vpack.c.bf16 %v149_v12, %v148_v11  ;;  %v150_v17 = vld [vmem:[%s468_s3 + $0x30] sm:$0xff]  ;;  %v151_v18 = vld [vmem:[%s468_s3 + $0x38] sm:$0xff]  ;;  %vm159_vm14 = vcmask 523264  }
   0x8   :  { %237 = vrot.lane.b32.xlu0 %v233_v14, %s350_s1  ;;  %297 = vmatpush3.bf16.msra.mxu0 %v296_v8  ;;  %v302_v21 = vpack.c.bf16 %v151_v18, %v150_v17  ;;  %v351_v31 = vmov 683565275   ;;  %v352_v33 = vmov 2475754826   ;;  %v353_v35 = vmov 2131351028  }
   0x9   :  { %298 = vmatprep.subr.bf16.mxu0 %v347_v3  ;;  %v44_v19 = vand.u32 2139095040, %v423_v15  ;;  %v41_v22 = vand.u32 2147483647, %v423_v15  ;;  %v354_v37 = vmov 2102212464   ;;  %vm43_vm8 = vcmp.lt.s32.totalorder %v423_v15, 0 }
   0xa   :  { %v355_v39 = vmov 920167782   ;;  %v356_v46 = vmov 1326507024   ;;  %vm133_vm13 = vweird.f32 %v423_v15  ;;  %s357_s19 = smov [#allocation2]   ;;  %vm234_vm15 = vcmask 228352  }
   0xb   :  { %v45_v20 = vshrl.u32 %v44_v19, 23  ;;  %v48_v25 = vand.u32 8388607, %v41_v22  ;;  %vm42_vm9 = vcmp.le.f32.partialorder %v41_v22, 0.7853982  ;;  %s248_s20 = sshll.u32 %s357_s19, 4  ;;  %s249_s20 = int_to_ptr.vmem [resolvable:$true] %s248_s20 }
   0xc   :  { %300 = vmatpush3.bf16.msra.mxu0 %v299_v16  ;;  %vm240_vm0 = vcmask 261344   ;;  %s323_s21 = scalar_lea.vmem %s249_s20, 128  ;;  %p328_p1 = scmp.lt.s32.totalorder %s249_s20, %s249_s20 }
   0xd   :  { %301 = vmatprep.subr.bf16.mxu0 %v347_v3  ;;  %v258_v23 = vadd.s32 4294967169, %v45_v20  ;;  %v49_v28 = vor.u32 8388608, %v48_v25  ;;  %p324_p0 = scmp.ne.s32.totalorder %s249_s20, %s323_s21  ;;  %p329_p2 = scmp.lt.s32.totalorder %s323_s21, %s323_s21 }
   0xf   :  { %v51_v24 = vadd.s32 1, %v258_v23  ;;  %v89_v48 = vshll.u32 %v49_v28, 8  ;;  %p330_p3 = por %p329_p2, %p328_p1 }
  0x10   :  { %303 = vmatpush3.bf16.msra.mxu0 %v302_v21 }
  0x11   :  { %vm52_vm1 = vcmp.gt.s32.totalorder %v51_v24, 0  ;;  %p331_p4 = pnand %p330_p3, %p324_p0 }
  0x12   :  { %v53_v26 = vsel %vm52_vm1, %v51_v24, 0 }
  0x13   :  { %v55_v27 = vand.u32 31, %v53_v26  ;;  %v54_v29 = vshrl.u32 %v53_v26, 5 }
  0x15   :  { %v56_v30 = vsub.s32 32, %v55_v27  ;;  %v58_v32 = vshll.u32 %v351_v31, %v55_v27  ;;  %v61_v34 = vshll.u32 %v352_v33, %v55_v27  ;;  %v64_v36 = vshll.u32 %v353_v35, %v55_v27 }
  0x16   :  { %v67_v38 = vshll.u32 %v354_v37, %v55_v27  ;;  %v70_v40 = vshll.u32 %v355_v39, %v55_v27  ;;  %vm73_vm2 = vcmp.lt.s32.totalorder %v54_v29, 1  ;;  %vm76_vm3 = vcmp.lt.s32.totalorder %v54_v29, 4 }
  0x17   :  { %v57_v41 = vshrl.u32 %v351_v31, %v56_v30  ;;  %v59_v42 = vshrl.u32 %v352_v33, %v56_v30  ;;  %v62_v43 = vshrl.u32 %v353_v35, %v56_v30  ;;  %v65_v44 = vshrl.u32 %v354_v37, %v56_v30 }
  0x18   :  { %v68_v45 = vshrl.u32 %v355_v39, %v56_v30  ;;  %v71_v47 = vshrl.u32 %v356_v46, %v56_v30  ;;  %vm74_vm4 = vcmp.lt.s32.totalorder %v54_v29, 2  ;;  %vm75_vm5 = vcmp.lt.s32.totalorder %v54_v29, 3 }
  0x19   :  { %v60_v49 = vor.u32 %v59_v42, %v58_v32  ;;  %v63_v50 = vor.u32 %v62_v43, %v61_v34  ;;  %v66_v51 = vor.u32 %v65_v44, %v64_v36 }
  0x1a   :  { %v69_v52 = vor.u32 %v68_v45, %v67_v38  ;;  %v72_v53 = vor.u32 %v71_v47, %v70_v40  ;;  %v262_v47 = vld [vmem:[%s469_s4] ss:$0 sm:$0xff] }
  0x1b   :  { %v77_v54 = vsel %vm73_vm2, %v57_v41, %v60_v49  ;;  %v78_v55 = vsel %vm76_vm3, %v66_v51, 2102212464  ;;  %v81_v56 = vsel %vm73_vm2, %v60_v49, %v63_v50  ;;  %v85_v57 = vsel %vm73_vm2, %v63_v50, %v66_v51 }
  0x1c   :  { %v79_v58 = vsel %vm75_vm5, %v63_v50, %v78_v55  ;;  %v82_v59 = vsel %vm76_vm3, %v69_v52, 920167782  ;;  %v86_v60 = vsel %vm76_vm3, %v72_v53, 1326507024 }
  0x1d   :  { %v83_v61 = vsel %vm75_vm5, %v66_v51, %v82_v59  ;;  %v87_v62 = vsel %vm75_vm5, %v69_v52, %v86_v60  ;;  %v80_v63 = vsel %vm74_vm4, %v77_v54, %v79_v58 }
  0x1e   :  { %v84_v0 = vsel %vm74_vm4, %v81_v56, %v83_v61  ;;  %v88_v1 = vsel %vm74_vm4, %v85_v57, %v87_v62  ;;  %v96_v6 = vmul.u32 %v89_v48, %v80_v63 }
  0x1f   :  { %v435_v2 = vmul.u32.u64.low %v89_v48, %v88_v1  ;;  %v436_v3 = vmul.u32.u64.high %v89_v48, %v88_v1, %v435_v2  ;;  %v438_v4 = vmul.u32.u64.low %v89_v48, %v84_v0  ;;  %v439_v5 = vmul.u32.u64.high %v89_v48, %v84_v0, %v438_v4 }
  0x21   :  { %vm98_vm6 = vc.u32 %v436_v3, %v438_v4  ;;  %v99_v7 = vadd.s32 1, %v439_v5  ;;  %v97_v19 = vadd.s32 %v438_v4, %v436_v3 }
  0x23   :  { %v100_v8 = vsel %vm98_vm6, %v99_v7, %v439_v5 }
  0x24   :  { %v101_v9 = vadd.s32 %v100_v8, %v96_v6 }
  0x26   :  { %v102_v10 = vadd.s32 536870912, %v101_v9 }
  0x28   :  { %v103_v11 = vshrl.u32 %v102_v10, 30 }
  0x2a   :  { %v104_v12 = vshll.u32 %v103_v11, 30  ;;  %v127_v34 = vsub.s32 4, %v103_v11 }
  0x2c   :  { %v105_v13 = vsub.s32 %v101_v9, %v104_v12  ;;  %v128_v37 = vsel %vm43_vm8, %v127_v34, %v103_v11 }
  0x2d   :  { %v130_v38 = vsel %vm42_vm9, 0, %v128_v37 }
  0x2e   :  { %v107_v14 = vsub.s32 0, %v105_v13  ;;  %v134_v39 = vand.u32 3, %v130_v38 }
  0x30   :  { %v259_v16 = vmin.u32 %v107_v14, %v105_v13  ;;  %vm139_vm10 = vcmp.eq.s32.totalorder %v134_v39, 2  ;;  %vm136_vm11 = vcmp.eq.s32.totalorder %v134_v39, 0  ;;  %vm135_vm12 = vcmp.lt.s32.totalorder %v134_v39, 2 }
  0x32   :  { %v109_v17 = vclz %v259_v16 }
  0x34   :  { %v260_v18 = vadd.s32 4294967294, %v109_v17 }
  0x36   :  { %vm261_vm7 = vcmp.lt.s32.totalorder %v260_v18, 0 }
  0x37   :  { %v112_v20 = vsel %vm261_vm7, 0, %v260_v18 }
  0x38   :  { %v113_v21 = vsub.s32 32, %v112_v20  ;;  %v114_v23 = vshll.u32 %v105_v13, %v112_v20  ;;  %v117_v24 = vsub.s32 4294967266, %v112_v20 }
  0x3a   :  { %v115_v25 = vshrl.u32 %v97_v19, %v113_v21  ;;  %v118_v26 = vadd.s32 127, %v117_v24 }
  0x3c   :  { %v116_v27 = vor.u32 %v115_v25, %v114_v23  ;;  %v119_v28 = vshll.u32 %v118_v26, 23 }
  0x3e   :  { %v120_v29 = vor.u32 4788187, %v119_v28  ;;  %v123_v30 = vcvt.s32.f32 %v116_v27 }
  0x40   :  { %v121_v31 = vand.u32 2147483647, %v120_v29 }
  0x42   :  { %v124_v32 = vmul.f32 %v123_v30, %v121_v31 }
  0x44   :  { %v125_v33 = vxor.u32 2147483648, %v124_v32 }
  0x46   :  { %v126_v35 = vsel %vm43_vm8, %v125_v33, %v124_v32 }
  0x47   :  { %v129_v36 = vsel %vm42_vm9, %v423_v15, %v126_v35 }
  0x48   :  { %319 = vcosq.f32 %v129_v36 }
  0x49   :  { %321 = vsinq.f32 %v129_v36 }
  0x52   :  { %v320_v40 = vpop.eup %319 }
  0x53   :  { %v322_v41 = vpop.eup %321  ;;  %v140_v42 = vxor.u32 2147483648, %v320_v40 }
  0x54   :  { %v137_v43 = vxor.u32 2147483648, %v322_v41 }
  0x55   :  { %v141_v22 = vsel %vm139_vm10, %v140_v42, %v322_v41 }
  0x56   :  { %v138_v44 = vsel %vm136_vm11, %v320_v40, %v137_v43 }
  0x57   :  { %v142_v45 = vsel %vm135_vm12, %v138_v44, %v141_v22 }
  0x58   :  { %v143_v46 = vsel %vm133_vm13, nan, %v142_v45 }
  0x59   :  { %290 = vmatmul.mubr.msk.f32.vlgmr.msra.gmra.mrb[0].mxu0 %vm159_vm14, %v143_v46 }
  0x7a   :  { %v238_v51 = vpop.permute.xlu0 %237 }
 0x12c   :  { %v229_v48 = vpop.f32.mrb[0].mxu0 }
 0x12d   :  { %v230_v49 = vadd.f32 %v262_v47, %v229_v48  ;;  %v291_v50 = vpop.f32.mrb[1].mxu0 }
 0x12f   :  { %235 = vst.msk [vmem:[#allocation2] sm:$0xff] %vm234_vm15, %v230_v49 }
 0x130   :  { %241 = vst.msk [vmem:[#allocation2] sm:$0xff] %vm240_vm0, %v238_v51 }
 0x131   :  { %334 = shalt.err (!%p331_p4)
}
 0x132   :  { %s335_s23 = scalar_lea.hbm %s471_s6, 128 }
 0x133   :  { %p336_p5 = scmp.ne.s32.totalorder %s471_s6, %s335_s23  ;;  %p339_p6 = scmp.lt.u32.totalorder %s335_s23, %s471_s6 }
 0x135   :  { %p341_p7 = pnand %p339_p6, %p336_p5 }
 0x137   :  { %344 = shalt.err (!%p341_p7)
}
 0x138   :  { %251 = dma.vmem_to_hbm [thread:$0]  %s249_s20, 128, %s471_s6, [#allocation3]  }
 0x139   :  { %345 = dma.done.wait [#allocation3], 128  }
 0x13a   :  { %346 = vsyncadd [#allocation3], 4294967168 }
 0x13b   :  { %255 = vsyncpa [#allocation3], 1 }

</bundles_post_ra>
